<compile_context>
chip_gen: v7x
topology: tpu7x:2x2x1
jax: 0.10.0
libtpu: 0.0.40
codegen_flags: <defaults>
</compile_context>

<pallas_src>
import functools

import jax
import jax.numpy as jnp
import numpy as np
from jax.experimental import pallas as pl
from jax.experimental.pallas import tpu as pltpu


_SQRT1_2 = 0.7071067811865476  # 1/sqrt(2)


def _erf(z):
    """Abramowitz & Stegun 7.1.26 erf approximation (max abs err ~1.5e-7).

    Built only from mul/add/div/exp/where so it lowers on the TPU VPU/EUP while keeping
    torch.nn.GELU()'s exact-erf semantics to ~1e-7.
    """
    a1, a2, a3, a4, a5 = (0.254829592, -0.284496736, 1.421413741,
                          -1.453152027, 1.061405429)
    p = 0.3275911
    az = jnp.abs(z)
    t = 1.0 / (1.0 + p * az)
    poly = ((((a5 * t + a4) * t + a3) * t + a2) * t + a1) * t
    e = 1.0 - poly * jnp.exp(-az * az)
    return jnp.where(z < 0.0, -e, e)


def _gelu_exact(x):
    return 0.5 * x * (1.0 + _erf(x * _SQRT1_2))


def _adapter_kernel(x_ref, w1_ref, b1_ref, w2_ref, b2_ref, o_ref, *,
                    compute_dtype, skip_connect):
    # x_ref : (tm, D)  f32 row tile of the flattened input
    # w1_ref: (D, Dh)  down-projection weight (pre-transposed, compute_dtype)
    # b1_ref: (1, Dh)  f32
    # w2_ref: (Dh, D)  up-projection weight (pre-transposed, compute_dtype)
    # b2_ref: (1, D)   f32
    x = x_ref[...]                                    # f32
    xc = x.astype(compute_dtype)

    # Down-projection: single lane-dense MXU matmul, f32 accumulation.
    h = jnp.dot(xc, w1_ref[...], preferred_element_type=jnp.float32)
    h = h + b1_ref[...]

    # Exact-erf GELU (matches torch.nn.GELU() default).
    h = _gelu_exact(h)

    # Up-projection: single lane-dense MXU matmul, f32 accumulation.
    y = jnp.dot(h.astype(compute_dtype), w2_ref[...],
                preferred_element_type=jnp.float32)
    y = y + b2_ref[...]

    if skip_connect:
        y = x + y                                     # residual in f32 (un-quantized x)
    o_ref[...] = y.astype(o_ref.dtype)


def _round_up(v, m):
    return ((v + m - 1) // m) * m


def _padded_tile_bytes(rows, cols, itemsize):
    # VMEM pads the last two dims to the native (sublane, 128) tile; narrow dtypes pack
    # proportionally more rows per sublane tile.
    sublane = 8 * (4 // itemsize)
    return _round_up(rows, sublane) * _round_up(cols, 128) * itemsize


def _vmem_budget(tm, D, Dh, x_itemsize, w_itemsize):
    per_buf = (
        _padded_tile_bytes(tm, D, x_itemsize)      # x tile
        + _padded_tile_bytes(tm, D, x_itemsize)    # out tile
        + _padded_tile_bytes(D, Dh, w_itemsize)    # W1^T
        + _padded_tile_bytes(Dh, D, w_itemsize)    # W2^T
        + _padded_tile_bytes(1, Dh, 4)             # b1
        + _padded_tile_bytes(1, D, 4)              # b2
        + _padded_tile_bytes(tm, Dh, 4)            # hidden intermediate (vregs / spill)
    )
    est = 2 * per_buf                               # double buffering
    # Explicit budget (perf feedback) with a generous margin, capped so it stays within
    # every generation's scoped-VMEM ceiling (v7x has only 64 MiB physical VMEM).
    return int(min(32 * 1024 * 1024, max(16 * 1024 * 1024, 4 * est)))


def adapter_pallas(x, w_fc1, b_fc1, w_fc2, b_fc2, *, skip_connect=True,
                   compute_dtype=jnp.bfloat16, block_rows=256):
    """Adapter forward.

    x:      (B, N, D) float32
    w_fc1:  (Dh, D), b_fc1: (Dh,)   -- torch nn.Linear layout (out_features, in_features)
    w_fc2:  (D, Dh), b_fc2: (D,)
    """
    B, N, D = x.shape
    Dh = w_fc1.shape[0]
    M = B * N
    x2 = x.reshape(M, D)

    tm = min(block_rows, M)
    grid = (pl.cdiv(M, tm),)

    # One-time JAX glue: transpose weights to lane-dense (in, out) layout and pre-cast
    # them to the MXU compute dtype; biases stay f32.
    w1t = w_fc1.T.astype(compute_dtype)              # (D, Dh)
    w2t = w_fc2.T.astype(compute_dtype)              # (Dh, D)
    b1 = b_fc1.reshape(1, Dh).astype(jnp.float32)
    b2 = b_fc2.reshape(1, D).astype(jnp.float32)

    kernel = functools.partial(_adapter_kernel,
                               compute_dtype=compute_dtype,
                               skip_connect=skip_connect)

    wbytes = jnp.dtype(compute_dtype).itemsize
    cost = pl.CostEstimate(
        flops=4 * M * D * Dh,                        # two dense matmuls
        transcendentals=M * Dh,                      # one exp per hidden element (erf)
        bytes_accessed=(2 * M * D * 4) + (2 * D * Dh) * wbytes + (D + Dh) * 4,
    )

    out2 = pl.pallas_call(
        kernel,
        out_shape=jax.ShapeDtypeStruct((M, D), x.dtype),
        grid_spec=pltpu.PrefetchScalarGridSpec(
            num_scalar_prefetch=0,
            grid=grid,
            in_specs=[
                pl.BlockSpec((tm, D), lambda i: (i, 0)),   # x row tile
                pl.BlockSpec((D, Dh), lambda i: (0, 0)),   # W1^T (constant index)
                pl.BlockSpec((1, Dh), lambda i: (0, 0)),   # b1
                pl.BlockSpec((Dh, D), lambda i: (0, 0)),   # W2^T (constant index)
                pl.BlockSpec((1, D), lambda i: (0, 0)),    # b2
            ],
            out_specs=pl.BlockSpec((tm, D), lambda i: (i, 0)),
        ),
        compiler_params=pltpu.CompilerParams(
            dimension_semantics=("parallel",),   # row tiles independent -> megacore on v7x
            vmem_limit_bytes=_vmem_budget(tm, D, Dh, x.dtype.itemsize, wbytes),
        ),
        cost_estimate=cost,
    )(x2, w1t, b1, w2t, b2)

    return out2.reshape(B, N, D)


def adapter_reference(x, w_fc1, b_fc1, w_fc2, b_fc2, skip_connect=True):
    """Pure-JAX mirror of the PyTorch Adapter.forward, for verification."""
    hp = jax.lax.Precision.HIGHEST
    h = jnp.einsum("bnd,hd->bnh", x, w_fc1, precision=hp) + b_fc1    # nn.Linear: x @ W^T + b
    h = jax.nn.gelu(h, approximate=False)                            # torch nn.GELU() (exact erf)
    y = jnp.einsum("bnh,dh->bnd", h, w_fc2, precision=hp) + b_fc2
    return x + y if skip_connect else y


if __name__ == "__main__":
    # Small shapes consistent with the module: B=2, N=8 tokens, D_features=32,
    # mlp_ratio=0.25 -> D_hidden_features=8, skip_connect=True.
    B, N, D = 2, 8, 32
    Dh = int(D * 0.25)

    key = jax.random.PRNGKey(0)
    kx, k1, kb1, k2, kb2 = jax.random.split(key, 5)
    x = jax.random.normal(kx, (B, N, D), dtype=jnp.float32)
    w_fc1 = jax.random.normal(k1, (Dh, D), dtype=jnp.float32) * 0.05
    b_fc1 = jax.random.normal(kb1, (Dh,), dtype=jnp.float32) * 0.05
    w_fc2 = jax.random.normal(k2, (D, Dh), dtype=jnp.float32) * 0.05
    b_fc2 = jax.random.normal(kb2, (D,), dtype=jnp.float32) * 0.05

    ref = adapter_reference(x, w_fc1, b_fc1, w_fc2, b_fc2, skip_connect=True)

    # Full-precision path: tight check against the exact-erf f32 reference.
    out_f32 = adapter_pallas(x, w_fc1, b_fc1, w_fc2, b_fc2,
                             skip_connect=True, compute_dtype=jnp.float32)
    out_f32 = jax.block_until_ready(out_f32)
    np.testing.assert_allclose(np.asarray(out_f32), np.asarray(ref),
                               rtol=1e-3, atol=1e-3)

    # Default performance path: bf16 MXU operands, f32 accumulation, f32 residual.
    out_bf16 = adapter_pallas(x, w_fc1, b_fc1, w_fc2, b_fc2, skip_connect=True)
    out_bf16 = jax.block_until_ready(out_bf16)
    np.testing.assert_allclose(np.asarray(out_bf16), np.asarray(ref),
                               rtol=2e-2, atol=2e-2)

    print("KERNEL_OK")
</pallas_src>

<mosaic_0001>
module attributes {stable_mosaic.version = 11 : i64} {
  func.func @_adapter_kernel(%arg0: i32, %arg1: memref<16x32xf32, #tpu.memory_space<vmem>>, %arg2: memref<32x8xf32, #tpu.memory_space<vmem>>, %arg3: memref<1x8xf32, #tpu.memory_space<vmem>>, %arg4: memref<8x32xf32, #tpu.memory_space<vmem>>, %arg5: memref<1x32xf32, #tpu.memory_space<vmem>>, %arg6: memref<16x32xf32, #tpu.memory_space<vmem>>) attributes {dimension_semantics = [#tpu.dimension_semantics<parallel>], iteration_bounds = array<i64: 1>, scalar_prefetch = 0 : i64, scratch_operands = 0 : i64, tpu.core_type = #tpu.core_type<tc>, window_params = [{transform_indices = @transform_0, window_bounds = array<i64: 16, 32>}, {pipeline_mode = #tpu.pipeline_mode<synchronous>, transform_indices = @transform_1, window_bounds = array<i64: 32, 8>}, {pipeline_mode = #tpu.pipeline_mode<synchronous>, transform_indices = @transform_2, window_bounds = array<i64: 1, 8>}, {pipeline_mode = #tpu.pipeline_mode<synchronous>, transform_indices = @transform_3, window_bounds = array<i64: 8, 32>}, {pipeline_mode = #tpu.pipeline_mode<synchronous>, transform_indices = @transform_4, window_bounds = array<i64: 1, 32>}, {transform_indices = @transform_5, window_bounds = array<i64: 16, 32>}]} {
    %c0 = arith.constant 0 : index
    %c0_0 = arith.constant 0 : index
    %0 = vector.load %arg1[%c0, %c0_0] : memref<16x32xf32, #tpu.memory_space<vmem>>, vector<16x32xf32>
    %c0_1 = arith.constant 0 : index
    %c0_2 = arith.constant 0 : index
    %1 = vector.load %arg2[%c0_1, %c0_2] : memref<32x8xf32, #tpu.memory_space<vmem>>, vector<32x8xf32>
    %cst = arith.constant dense<0.000000e+00> : vector<16x8xf32>
    %2 = tpu.matmul %0, %1, %cst {dimension_numbers = #tpu.dot_dimension_numbers<[1], [0], [0], [1], [0, 0, 1, 1], [], []>} : vector<16x32xf32>, vector<32x8xf32>, vector<16x8xf32> -> vector<16x8xf32>
    %c0_3 = arith.constant 0 : index
    %c0_4 = arith.constant 0 : index
    %3 = vector.load %arg3[%c0_3, %c0_4] : memref<1x8xf32, #tpu.memory_space<vmem>>, vector<1x8xf32>
    %4 = vector.broadcast %3 : vector<1x8xf32> to vector<16x8xf32>
    %5 = arith.addf %2, %4 : vector<16x8xf32>
    %cst_5 = arith.constant 5.000000e-01 : f32
    %6 = vector.broadcast %cst_5 : f32 to vector<16x8xf32>
    %7 = arith.mulf %6, %5 : vector<16x8xf32>
    %cst_6 = arith.constant 0.707106769 : f32
    %8 = vector.broadcast %cst_6 : f32 to vector<16x8xf32>
    %9 = arith.mulf %5, %8 : vector<16x8xf32>
    %10 = math.absf %9 : vector<16x8xf32>
    %cst_7 = arith.constant 0.327591091 : f32
    %11 = vector.broadcast %cst_7 : f32 to vector<16x8xf32>
    %12 = arith.mulf %11, %10 : vector<16x8xf32>
    %cst_8 = arith.constant 1.000000e+00 : f32
    %13 = vector.broadcast %cst_8 : f32 to vector<16x8xf32>
    %14 = arith.addf %13, %12 : vector<16x8xf32>
    %cst_9 = arith.constant 1.000000e+00 : f32
    %15 = vector.broadcast %cst_9 : f32 to vector<16x8xf32>
    %16 = arith.divf %15, %14 : vector<16x8xf32>
    %cst_10 = arith.constant 1.06140542 : f32
    %17 = vector.broadcast %cst_10 : f32 to vector<16x8xf32>
    %18 = arith.mulf %17, %16 : vector<16x8xf32>
    %cst_11 = arith.constant -1.45315206 : f32
    %19 = vector.broadcast %cst_11 : f32 to vector<16x8xf32>
    %20 = arith.addf %18, %19 : vector<16x8xf32>
    %21 = arith.mulf %20, %16 : vector<16x8xf32>
    %cst_12 = arith.constant 1.42141378 : f32
    %22 = vector.broadcast %cst_12 : f32 to vector<16x8xf32>
    %23 = arith.addf %21, %22 : vector<16x8xf32>
    %24 = arith.mulf %23, %16 : vector<16x8xf32>
    %cst_13 = arith.constant -0.284496725 : f32
    %25 = vector.broadcast %cst_13 : f32 to vector<16x8xf32>
    %26 = arith.addf %24, %25 : vector<16x8xf32>
    %27 = arith.mulf %26, %16 : vector<16x8xf32>
    %cst_14 = arith.constant 0.254829586 : f32
    %28 = vector.broadcast %cst_14 : f32 to vector<16x8xf32>
    %29 = arith.addf %27, %28 : vector<16x8xf32>
    %30 = arith.mulf %29, %16 : vector<16x8xf32>
    %cst_15 = arith.constant 0.000000e+00 : f32
    %31 = vector.broadcast %cst_15 : f32 to vector<16x8xf32>
    %32 = arith.subf %31, %10 : vector<16x8xf32>
    %33 = arith.mulf %32, %10 : vector<16x8xf32>
    %34 = math.exp %33 : vector<16x8xf32>
    %35 = arith.mulf %30, %34 : vector<16x8xf32>
    %cst_16 = arith.constant 1.000000e+00 : f32
    %36 = vector.broadcast %cst_16 : f32 to vector<16x8xf32>
    %37 = arith.subf %36, %35 : vector<16x8xf32>
    %cst_17 = arith.constant 0.000000e+00 : f32
    %38 = vector.broadcast %cst_17 : f32 to vector<16x8xf32>
    %39 = arith.cmpf olt, %9, %38 : vector<16x8xf32>
    %cst_18 = arith.constant 0.000000e+00 : f32
    %40 = vector.broadcast %cst_18 : f32 to vector<16x8xf32>
    %41 = arith.subf %40, %37 : vector<16x8xf32>
    %42 = arith.select %39, %41, %37 : vector<16x8xi1>, vector<16x8xf32>
    %cst_19 = arith.constant 1.000000e+00 : f32
    %43 = vector.broadcast %cst_19 : f32 to vector<16x8xf32>
    %44 = arith.addf %43, %42 : vector<16x8xf32>
    %45 = arith.mulf %7, %44 : vector<16x8xf32>
    %c0_20 = arith.constant 0 : index
    %c0_21 = arith.constant 0 : index
    %46 = vector.load %arg4[%c0_20, %c0_21] : memref<8x32xf32, #tpu.memory_space<vmem>>, vector<8x32xf32>
    %cst_22 = arith.constant dense<0.000000e+00> : vector<16x32xf32>
    %47 = tpu.matmul %45, %46, %cst_22 {dimension_numbers = #tpu.dot_dimension_numbers<[1], [0], [0], [1], [0, 0, 1, 1], [], []>} : vector<16x8xf32>, vector<8x32xf32>, vector<16x32xf32> -> vector<16x32xf32>
    %c0_23 = arith.constant 0 : index
    %c0_24 = arith.constant 0 : index
    %48 = vector.load %arg5[%c0_23, %c0_24] : memref<1x32xf32, #tpu.memory_space<vmem>>, vector<1x32xf32>
    %49 = vector.broadcast %48 : vector<1x32xf32> to vector<16x32xf32>
    %50 = arith.addf %47, %49 : vector<16x32xf32>
    %51 = arith.addf %0, %50 : vector<16x32xf32>
    %c0_25 = arith.constant 0 : index
    %c0_26 = arith.constant 0 : index
    %52 = vector.load %arg6[%c0_25, %c0_26] : memref<16x32xf32, #tpu.memory_space<vmem>>, vector<16x32xf32>
    tpu.vector_store %arg6[%c0_25, %c0_26], %51 {strides = array<i32>} : memref<16x32xf32, #tpu.memory_space<vmem>>, vector<16x32xf32>,
    return
  }
  func.func @transform_0(%arg0: i32) -> (i32, i32) {
    %c0_i32 = arith.constant 0 : i32
    %c0_i32_0 = arith.constant 0 : i32
    return %arg0, %c0_i32 : i32, i32
  }
  func.func @transform_1(%arg0: i32) -> (i32, i32) {
    %c0_i32 = arith.constant 0 : i32
    %c0_i32_0 = arith.constant 0 : i32
    %c0_i32_1 = arith.constant 0 : i32
    return %c0_i32, %c0_i32_0 : i32, i32
  }
  func.func @transform_2(%arg0: i32) -> (i32, i32) {
    %c0_i32 = arith.constant 0 : i32
    %c0_i32_0 = arith.constant 0 : i32
    %c0_i32_1 = arith.constant 0 : i32
    return %c0_i32, %c0_i32_0 : i32, i32
  }
  func.func @transform_3(%arg0: i32) -> (i32, i32) {
    %c0_i32 = arith.constant 0 : i32
    %c0_i32_0 = arith.constant 0 : i32
    %c0_i32_1 = arith.constant 0 : i32
    return %c0_i32, %c0_i32_0 : i32, i32
  }
  func.func @transform_4(%arg0: i32) -> (i32, i32) {
    %c0_i32 = arith.constant 0 : i32
    %c0_i32_0 = arith.constant 0 : i32
    %c0_i32_1 = arith.constant 0 : i32
    return %c0_i32, %c0_i32_0 : i32, i32
  }
  func.func @transform_5(%arg0: i32) -> (i32, i32) {
    %c0_i32 = arith.constant 0 : i32
    %c0_i32_0 = arith.constant 0 : i32
    return %arg0, %c0_i32 : i32, i32
  }
}

</mosaic_0001>

<bundles_post_ra>
// kernel: tpu_custom_call.1
= control target key start
LH: loop header
LB: loop body
LE: loop exit
PB: predicated region body
PF: predicated region fallthrough
CT: control target
= control target key end

     0   :  { %vm34_vm0 = vcmask 261120   ;;  %s438_s0 = inlined_call_operand.vmem [shape: f32[16,32], index: 0, kind: input, shape index: {}]   ;;  %s439_s1 = inlined_call_operand.vmem [shape: f32[32,8], index: 1, kind: input, shape index: {}]   ;;  %s440_s2 = inlined_call_operand.vmem [shape: f32[1,8], index: 2, kind: input, shape index: {}]   ;;  %s441_s3 = inlined_call_operand.vmem [shape: f32[8,32], index: 3, kind: input, shape index: {}]   ;;  %s442_s4 = inlined_call_operand.vmem [shape: f32[1,32], index: 4, kind: input, shape index: {}]   ;;  %s443_s5 = inlined_call_operand.hbm [shape: f32[16,32], index: 5, kind: output, shape index: {}]  }
   0x1   :  { %v23_v0 = vld [vmem:[%s439_s1] sm:$0xff]  ;;  %v24_v1 = vld [vmem:[%s439_s1 + $0x8] sm:$0xff]  ;;  %v25_v2 = vld [vmem:[%s439_s1 + $0x10] sm:$0xff] }
   0x2   :  { %v311_v3 = vpack.c.bf16 %v24_v1, %v23_v0  ;;  %v26_v4 = vld [vmem:[%s439_s1 + $0x18] sm:$0xff]  ;;  %v402_v5 = vld [vmem:[%s438_s0] sm:$0xff] }
   0x3   :  { %v315_v6 = vpack.c.bf16 %v26_v4, %v25_v2  ;;  %303 = vmatprep.mubr.msk.f32.mxu0 %vm34_vm0, %v402_v5 }
   0x4   :  { %10 = vsyncpa [#allocation3], 0  ;;  %312 = vmatprep.subr.bf16.mxu0 %v311_v3  ;;  %v409_v7 = vld [vmem:[%s438_s0 + $0x8] sm:$0xff]  ;;  %v170_v8 = vld [vmem:[%s441_s3] sm:$0xff]  ;;  %vm178_vm3 = vcmask 64512   ;;  %s354_s3 = smov [#allocation2]  }
   0x5   :  { %314 = vmatpush3.bf16.msra.mxu0 %v311_v3  ;;  %306 = vmatprep.subr.mxu1 %v170_v8  ;;  %v280_v9 = vld [vmem:[%s440_s2] ss:$0 sm:$0xff]  ;;  %s269_s8 = sshll.u32 %s354_s3, 4  ;;  %s270_s8 = int_to_ptr.vmem [resolvable:$true] %s269_s8 }
   0x6   :  { %316 = vmatprep.subr.bf16.mxu0 %v315_v6  ;;  %307 = vmatpush3.msra.mxu1 %v170_v8  ;;  %v283_v0 = vld [vmem:[%s442_s4] ss:$0 sm:$0xff]  ;;  %s330_s9 = scalar_lea.vmem %s270_s8, 256  ;;  %p335_p1 = scmp.lt.s32.totalorder %s270_s8, %s270_s8 }
   0x7   :  { %p331_p0 = scmp.ne.s32.totalorder %s270_s8, %s330_s9  ;;  %p336_p2 = scmp.lt.s32.totalorder %s330_s9, %s330_s9 }
   0x9   :  { %318 = vmatpush3.bf16.msra.mxu0 %v315_v6  ;;  %p337_p3 = por %p336_p2, %p335_p1 }
   0xb   :  { %p338_p4 = pnand %p337_p3, %p331_p0 }
   0xc   :  { %304 = vmatmul.mubr.msk.f32.vlgmr.msra.gmra.mrb[0].mxu0 %vm34_vm0, %v409_v7 }
  0xdf   :  { %v305_v10 = vpop.f32.mrb[0].mxu0 }
  0xe0   :  { %v113_v11 = vadd.f32 %v305_v10, %v280_v9  ;;  %v107_v12 = vpop.f32.mrb[1].mxu0 }
  0xe1   :  { %v108_v13 = vadd.f32 %v280_v9, %v107_v12 }
  0xe2   :  { %v119_v14 = vmul.f32 0.70710677, %v113_v11  ;;  %v117_v61 = vmul.f32 0.5, %v113_v11 }
  0xe3   :  { %v118_v15 = vmul.f32 0.70710677, %v108_v13  ;;  %v116_v59 = vmul.f32 0.5, %v108_v13 }
  0xe4   :  { %v121_v16 = vand.u32 2147483647, %v119_v14  ;;  %vm161_vm1 = vcmp.lt.f32.partialorder %v119_v14, 0.0 }
  0xe5   :  { %v120_v17 = vand.u32 2147483647, %v118_v15  ;;  %vm160_vm2 = vcmp.lt.f32.partialorder %v118_v15, 0.0 }
  0xe6   :  { %v123_v18 = vmul.f32 0.3275911, %v121_v16  ;;  %v149_v22 = vsub.f32 0.0, %v121_v16 }
  0xe7   :  { %v122_v19 = vmul.f32 0.3275911, %v120_v17  ;;  %v148_v23 = vsub.f32 0.0, %v120_v17 }
  0xe8   :  { %v125_v20 = vadd.f32 1.0, %v123_v18  ;;  %v151_v25 = vmul.f32 %v149_v22, %v121_v16 }
  0xe9   :  { %v124_v21 = vadd.f32 1.0, %v122_v19  ;;  %v150_v28 = vmul.f32 %v148_v23, %v120_v17 }
  0xea   :  { %322 = vrcp.f32 %v125_v20  ;;  %v154_v31 = vmul.f32 1.442695, %v151_v25 }
  0xeb   :  { %324 = vrcp.f32 %v124_v21  ;;  %v152_v34 = vmul.f32 1.442695, %v150_v28 }
  0xec   :  { %326 = vpow2.f32 %v154_v31 }
  0xed   :  { %328 = vpow2.f32 %v152_v34 }
  0xf4   :  { %v323_v24 = vpop.eup %322 }
  0xf5   :  { %v325_v26 = vpop.eup %324  ;;  %v131_v27 = vmul.f32 1.0614054, %v323_v24 }
  0xf6   :  { %v130_v29 = vmul.f32 1.0614054, %v325_v26  ;;  %v327_v47 = vpop.eup %326 }
  0xf7   :  { %v133_v30 = vadd.f32 -1.4531521, %v131_v27  ;;  %v329_v49 = vpop.eup %328 }
  0xf8   :  { %v132_v32 = vadd.f32 -1.4531521, %v130_v29 }
  0xf9   :  { %v135_v33 = vmul.f32 %v323_v24, %v133_v30 }
  0xfa   :  { %v134_v35 = vmul.f32 %v325_v26, %v132_v32 }
  0xfb   :  { %v137_v36 = vadd.f32 1.4214138, %v135_v33 }
  0xfc   :  { %v136_v37 = vadd.f32 1.4214138, %v134_v35 }
  0xfd   :  { %v139_v38 = vmul.f32 %v323_v24, %v137_v36 }
  0xfe   :  { %v138_v39 = vmul.f32 %v325_v26, %v136_v37 }
  0xff   :  { %v141_v40 = vadd.f32 -0.28449672, %v139_v38 }
 0x100   :  { %v140_v41 = vadd.f32 -0.28449672, %v138_v39 }
 0x101   :  { %v143_v42 = vmul.f32 %v323_v24, %v141_v40 }
 0x102   :  { %v142_v43 = vmul.f32 %v325_v26, %v140_v41 }
 0x103   :  { %v145_v44 = vadd.f32 0.2548296, %v143_v42 }
 0x104   :  { %v144_v45 = vadd.f32 0.2548296, %v142_v43 }
 0x105   :  { %v147_v46 = vmul.f32 %v323_v24, %v145_v44 }
 0x106   :  { %v146_v48 = vmul.f32 %v325_v26, %v144_v45 }
 0x107   :  { %v157_v50 = vmul.f32 %v327_v47, %v147_v46 }
 0x108   :  { %v156_v51 = vmul.f32 %v329_v49, %v146_v48 }
 0x109   :  { %v159_v52 = vsub.f32 1.0, %v157_v50 }
 0x10a   :  { %v158_v53 = vsub.f32 1.0, %v156_v51 }
 0x10b   :  { %v163_v54 = vsub.f32 0.0, %v159_v52 }
 0x10c   :  { %v162_v55 = vsub.f32 0.0, %v158_v53 }
 0x10d   :  { %v165_v56 = vsel %vm161_vm1, %v163_v54, %v159_v52 }
 0x10e   :  { %v167_v57 = vadd.f32 1.0, %v165_v56  ;;  %v164_v58 = vsel %vm160_vm2, %v162_v55, %v158_v53 }
 0x10f   :  { %v166_v60 = vadd.f32 1.0, %v164_v58 }
 0x110   :  { %v169_v63 = vmul.f32 %v167_v57, %v117_v61 }
 0x111   :  { %v168_v62 = vmul.f32 %v166_v60, %v116_v59 }
 0x113   :  { %308 = vmatprep.mubr.msk.f32.mxu1 %vm178_vm3, %v168_v62 }
 0x114   :  { %309 = vmatmul.mubr.msk.f32.vlgmr.msra.gmra.mrb[0].mxu1 %vm178_vm3, %v169_v63 }
 0x1e7   :  { %v310_v1 = vpop.f32.mrb[0].mxu1 }
 0x1e8   :  { %v257_v2 = vadd.f32 %v310_v1, %v283_v0  ;;  %v251_v3 = vpop.f32.mrb[1].mxu1 }
 0x1e9   :  { %v252_v4 = vadd.f32 %v283_v0, %v251_v3 }
 0x1ea   :  { %v261_v6 = vadd.f32 %v257_v2, %v409_v7 }
 0x1eb   :  { %v260_v8 = vadd.f32 %v252_v4, %v402_v5 }
 0x1ec   :  { %263 = vst.msk [vmem:[#allocation2 + $0x8] sm:$0xff] %vm34_vm0, %v261_v6 }
 0x1ed   :  { %262 = vst.msk [vmem:[#allocation2] sm:$0xff] %vm34_vm0, %v260_v8 }
 0x1ee   :  { %341 = shalt.err (!%p338_p4)
}
 0x1ef   :  { %s342_s11 = scalar_lea.hbm %s443_s5, 256 }
 0x1f0   :  { %p343_p5 = scmp.ne.s32.totalorder %s443_s5, %s342_s11  ;;  %p346_p6 = scmp.lt.u32.totalorder %s342_s11, %s443_s5 }
 0x1f2   :  { %p348_p7 = pnand %p346_p6, %p343_p5 }
 0x1f4   :  { %351 = shalt.err (!%p348_p7)
}
 0x1f5   :  { %s355_s16 = smov 128   ;;  %s356_s17 = smov 8  }
 0x1f6   :  { %275 = dma.vmem_to_hbm [thread:$0]  %s270_s8, 256, %s443_s5, [#allocation3], %s355_s16, %s355_s16, %s356_s17  }
 0x1f7   :  { %352 = dma.done.wait [#allocation3], 256  }
 0x1f8   :  { %353 = vsyncadd [#allocation3], 4294967040 }
 0x1f9   :  { %279 = vsyncpa [#allocation3], 1 }

</bundles_post_ra>
